<compile_context>
chip_gen: v7x
topology: tpu7x:2x2x1
jax: 0.10.0
libtpu: 0.0.40
codegen_flags: <defaults>
</compile_context>

<pallas_src>
import jax
import jax.numpy as jnp
from jax.experimental import pallas as pl
from jax.experimental.pallas import tpu as pltpu

BN_EPS = 1e-5


# ---------------------------------------------------------------------------
# Kernel
# ---------------------------------------------------------------------------
def second_stage_kernel(x_ref, w1_ref, b1_ref, w2_ref, b2_ref, out_ref):
    # x_ref:   (B, C*D)   bf16  class-packed input (pure reshape of w_f)
    # w1_ref:  (C*D, C*H) bf16  block-diagonal fc1 weight with BN folded in
    # b1_ref:  (1, C*H)   f32   folded fc1+BN bias
    # w2_ref:  (C*H, C)   bf16  block-diagonal fc2 weight
    # b2_ref:  (1, C)     f32   fc2 bias
    # out_ref: (B, C)     f32
    h = jnp.dot(x_ref[...], w1_ref[...], preferred_element_type=jnp.float32)
    h = jnp.maximum(h + b1_ref[...], 0.0)            # fused fc1 + BN + ReLU (f32)
    # Dropout: identity in eval mode.
    y = jnp.dot(h.astype(jnp.bfloat16), w2_ref[...],
                preferred_element_type=jnp.float32)
    out_ref[...] = (y + b2_ref[...]).astype(out_ref.dtype)


# ---------------------------------------------------------------------------
# One-time (model-load) parameter packing: BN fold + block-diagonal weights.
# ---------------------------------------------------------------------------
def pack_params(params):
    """Fold eval-mode BN into fc1 and build block-diagonal packed weights.

    Call ONCE at model load; the result is reused for every forward call.
    Packing cost is O(C*D*H) (scatter into zeros), no (C,D,C,H) temporary.
    """
    w1 = params['w1']            # (C, D, H)
    b1 = params['b1']            # (C, H)
    w2 = params['w2']            # (C, H, 1)
    b2 = params['b2']            # (C, 1)
    C, D, H = w1.shape

    # Fold eval-mode BatchNorm into fc1.
    scale = params['gamma'] * jax.lax.rsqrt(params['var'] + BN_EPS)   # (C, H)
    w1f = w1 * scale[:, None, :]                                      # (C, D, H)
    b1f = (b1 - params['mean']) * scale + params['beta']              # (C, H)

    # Block-diagonal fc1: w1_bd[c*D + d, c*H + h] = w1f[c, d, h]
    w1_bd = jnp.zeros((C * D, C * H), jnp.float32)
    # Block-diagonal fc2: w2_bd[c*H + h, c]       = w2[c, h, 0]
    w2_bd = jnp.zeros((C * H, C), jnp.float32)
    for c in range(C):           # C is a small static int; static slices
        w1_bd = w1_bd.at[c * D:(c + 1) * D, c * H:(c + 1) * H].set(w1f[c])
        w2_bd = w2_bd.at[c * H:(c + 1) * H, c].set(w2[c, :, 0])

    packed = dict(
        w1_bd=w1_bd.astype(jnp.bfloat16),     # MXU operands in bf16
        b1_bd=b1f.reshape(1, C * H),          # biases stay f32
        w2_bd=w2_bd.astype(jnp.bfloat16),
        b2_bd=b2.reshape(1, C),
    )
    return jax.tree_util.tree_map(jax.device_put, packed)


# ---------------------------------------------------------------------------
# Forward (jitted; per-call work is only reshape/cast + the Pallas call)
# ---------------------------------------------------------------------------
@jax.jit
def second_stage_forward(w_f, w1_bd, b1_bd, w2_bd, b2_bd):
    """w_f: (B, n_class, D) float32 -> (B, n_class) float32 (eval mode)."""
    B, C, D = w_f.shape
    # Contiguous reshape (no transpose) + bf16 cast for the MXU.
    x = w_f.reshape(B, C * D).astype(jnp.bfloat16)

    vmem = pl.BlockSpec(memory_space=pltpu.MemorySpace.VMEM)
    out = pl.pallas_call(
        second_stage_kernel,
        out_shape=jax.ShapeDtypeStruct((B, C), jnp.float32),
        in_specs=[vmem] * 5,
        out_specs=vmem,
    )(x, w1_bd, b1_bd, w2_bd, b2_bd)
    return out


# ---------------------------------------------------------------------------
# Pure-JAX per-class reference (unfolded BN, f32) for correctness checking.
# ---------------------------------------------------------------------------
def second_stage_reference(w_f, params):
    B, n_class, D = w_f.shape
    cols = []
    for i in range(n_class):
        x = w_f[:, i, :]
        h = x @ params['w1'][i] + params['b1'][i]
        h = (h - params['mean'][i]) / jnp.sqrt(params['var'][i] + BN_EPS)
        h = h * params['gamma'][i] + params['beta'][i]
        h = jnp.maximum(h, 0.0)
        y = h @ params['w2'][i] + params['b2'][i]
        cols.append(y)
    return jnp.concatenate(cols, axis=1)


def init_params(key, n_class, input_dim, hidden_dim):
    ks = jax.random.split(key, 7)
    w1 = jax.random.normal(ks[0], (n_class, input_dim, hidden_dim),
                           jnp.float32) * 0.05
    b1 = jax.random.normal(ks[1], (n_class, hidden_dim), jnp.float32) * 0.05
    gamma = 1.0 + 0.1 * jax.random.normal(ks[2], (n_class, hidden_dim),
                                          jnp.float32)
    beta = 0.1 * jax.random.normal(ks[3], (n_class, hidden_dim), jnp.float32)
    mean = 0.1 * jax.random.normal(ks[4], (n_class, hidden_dim), jnp.float32)
    var = 1.0 + 0.1 * jnp.abs(
        jax.random.normal(ks[5], (n_class, hidden_dim), jnp.float32))
    w2 = jax.random.normal(ks[6], (n_class, hidden_dim, 1), jnp.float32) * 0.05
    b2 = jnp.zeros((n_class, 1), jnp.float32)
    return dict(w1=w1, b1=b1, gamma=gamma, beta=beta, mean=mean, var=var,
                w2=w2, b2=b2)


if __name__ == "__main__":
    # Config: first_stage_feature_channel=64, second_stage_hidden_layer_num=32,
    #         n_class=3, batch=8
    B, n_class, D, H = 8, 3, 64, 32

    key = jax.random.PRNGKey(0)
    k_x, k_p = jax.random.split(key)
    w_f = jax.random.normal(k_x, (B, n_class, D), jnp.float32)
    params = init_params(k_p, n_class, D, H)

    # --- one-time packing (model load) ---------------------------------
    packed = pack_params(params)
    packed = jax.tree_util.tree_map(jax.block_until_ready, packed)

    # --- per-step forward (jitted; only reshape/cast + Pallas call) -----
    out = second_stage_forward(w_f, packed['w1_bd'], packed['b1_bd'],
                               packed['w2_bd'], packed['b2_bd'])
    out = jax.block_until_ready(out)

    ref = second_stage_reference(w_f, params)
    assert out.shape == (B, n_class), out.shape
    # bf16 MXU operands with f32 accumulation -> loosened tolerance.
    assert jnp.allclose(out, ref, atol=2e-2, rtol=2e-2), (
        "mismatch vs reference")

    print("KERNEL_OK")
</pallas_src>

<mosaic_0001>
module attributes {stable_mosaic.version = 11 : i64} {
  func.func @second_stage_kernel(%arg0: memref<8x192xbf16, #tpu.memory_space<vmem>>, %arg1: memref<192x96xbf16, #tpu.memory_space<vmem>>, %arg2: memref<1x96xf32, #tpu.memory_space<vmem>>, %arg3: memref<96x3xbf16, #tpu.memory_space<vmem>>, %arg4: memref<1x3xf32, #tpu.memory_space<vmem>>, %arg5: memref<8x3xf32, #tpu.memory_space<vmem>>) attributes {dimension_semantics = [], scalar_prefetch = 0 : i64, scratch_operands = 0 : i64, tpu.core_type = #tpu.core_type<tc>} {
    %c0 = arith.constant 0 : index
    %c0_0 = arith.constant 0 : index
    %0 = vector.load %arg0[%c0, %c0_0] : memref<8x192xbf16, #tpu.memory_space<vmem>>, vector<8x192xbf16>
    %c0_1 = arith.constant 0 : index
    %c0_2 = arith.constant 0 : index
    %1 = vector.load %arg1[%c0_1, %c0_2] : memref<192x96xbf16, #tpu.memory_space<vmem>>, vector<192x96xbf16>
    %cst = arith.constant dense<0.000000e+00> : vector<8x96xf32>
    %2 = tpu.matmul %0, %1, %cst {dimension_numbers = #tpu.dot_dimension_numbers<[1], [0], [0], [1], [0, 0, 1, 1], [], []>} : vector<8x192xbf16>, vector<192x96xbf16>, vector<8x96xf32> -> vector<8x96xf32>
    %c0_3 = arith.constant 0 : index
    %c0_4 = arith.constant 0 : index
    %3 = vector.load %arg2[%c0_3, %c0_4] : memref<1x96xf32, #tpu.memory_space<vmem>>, vector<1x96xf32>
    %4 = vector.broadcast %3 : vector<1x96xf32> to vector<8x96xf32>
    %5 = arith.addf %2, %4 : vector<8x96xf32>
    %cst_5 = arith.constant 0.000000e+00 : f32
    %6 = vector.broadcast %cst_5 : f32 to vector<8x96xf32>
    %7 = arith.maximumf %5, %6 : vector<8x96xf32>
    %8 = arith.truncf %7 : vector<8x96xf32> to vector<8x96xbf16>
    %c0_6 = arith.constant 0 : index
    %c0_7 = arith.constant 0 : index
    %9 = vector.load %arg3[%c0_6, %c0_7] : memref<96x3xbf16, #tpu.memory_space<vmem>>, vector<96x3xbf16>
    %cst_8 = arith.constant dense<0.000000e+00> : vector<8x3xf32>
    %10 = tpu.matmul %8, %9, %cst_8 {dimension_numbers = #tpu.dot_dimension_numbers<[1], [0], [0], [1], [0, 0, 1, 1], [], []>} : vector<8x96xbf16>, vector<96x3xbf16>, vector<8x3xf32> -> vector<8x3xf32>
    %c0_9 = arith.constant 0 : index
    %c0_10 = arith.constant 0 : index
    %11 = vector.load %arg4[%c0_9, %c0_10] : memref<1x3xf32, #tpu.memory_space<vmem>>, vector<1x3xf32>
    %12 = vector.broadcast %11 : vector<1x3xf32> to vector<8x3xf32>
    %13 = arith.addf %10, %12 : vector<8x3xf32>
    %c0_11 = arith.constant 0 : index
    %c0_12 = arith.constant 0 : index
    %14 = vector.load %arg5[%c0_11, %c0_12] : memref<8x3xf32, #tpu.memory_space<vmem>>, vector<8x3xf32>
    tpu.vector_store %arg5[%c0_11, %c0_12], %13 {strides = array<i32>} : memref<8x3xf32, #tpu.memory_space<vmem>>, vector<8x3xf32>,
    return
  }
}

</mosaic_0001>

<bundles_post_ra>
// kernel: second_stage_forward.1
= control target key start
LH: loop header
LB: loop body
LE: loop exit
PB: predicated region body
PF: predicated region fallthrough
CT: control target
= control target key end

     0   :  { %v352_v0 = vmov 0   ;;  %v353_v2 = vmov 0.0   ;;  %vm131_vm0 = vcmask 523264   ;;  %vm354_vm1 = vmmov 0   ;;  %s451_s1 = inlined_call_operand.vmem [shape: bf16[192,96], index: 1, kind: input, shape index: {}]   ;;  %s452_s0 = inlined_call_operand.vmem [shape: bf16[8,192], index: 0, kind: input, shape index: {}]   ;;  %s453_s3 = inlined_call_operand.vmem [shape: bf16[96,3], index: 3, kind: input, shape index: {}]   ;;  %s454_s2 = inlined_call_operand.vmem [shape: f32[1,96], index: 2, kind: input, shape index: {}]   ;;  %s455_s4 = inlined_call_operand.vmem [shape: f32[1,3], index: 4, kind: input, shape index: {}]   ;;  %s456_s5 = inlined_call_operand.vmem [shape: f32[8,3], index: 5, kind: output, shape index: {}]  }
   0x1   :  { %135 = vmatprep.subr.bf16.mxu0 %v352_v0  ;;  %v332_v1 = vld [vmem:[%s451_s1] sm:$0xff]   ;;  %313 = vmatprep.subr.bf16.mxu1 %v353_v2  ;;  %v333_v3 = vld [vmem:[%s451_s1 + $0x8] sm:$0xff]   ;;  %v334_v4 = vld [vmem:[%s451_s1 + $0x10] sm:$0xff]   ;;  %vm232_vm2 = vcmask 785408   ;;  %vm276_vm3 = vcmask 23552  }
   0x2   :  { %136 = vmatpush1.bf16.msra.mxu0 %v332_v1  ;;  %v335_v5 = vld [vmem:[%s451_s1 + $0x18] sm:$0xff]   ;;  %v21_v6 = vld [vmem:[%s452_s0] sm:$0xff]  ;;  %v347_v10 = vld [vmem:[%s453_s3 + $0x8] sm:$0xff]   ;;  %325 = vmatprep.mubr.msk.bf16.mxu1 %vm354_vm1, %v353_v2 }
   0x3   :  { %137 = vmatprep.subr.bf16.mxu0 %v352_v0  ;;  %v284_v7 = vcombine.high %v21_v6, %v21_v6  ;;  %v346_v8 = vld [vmem:[%s453_s3] sm:$0xff]   ;;  %v337_v11 = vld [vmem:[%s451_s1 + $0x28] sm:$0xff]   ;;  %v348_v12 = vld [vmem:[%s453_s3 + $0x10] sm:$0xff]   ;;  %v283_v20 = vcombine.low %v21_v6, %v21_v6 }
   0x4   :  { %v336_v9 = vld [vmem:[%s451_s1 + $0x20] sm:$0xff]   ;;  %314 = vmatpush3.bf16.msra.mxu1 %v346_v8  ;;  %v338_v13 = vld [vmem:[%s451_s1 + $0x30] sm:$0xff]   ;;  %v349_v14 = vld [vmem:[%s453_s3 + $0x18] sm:$0xff]  }
   0x5   :  { %297 = vmatprep.mubr.msk.bf16.mxu0 %vm131_vm0, %v284_v7  ;;  %315 = vmatprep.subr.bf16.mxu1 %v353_v2  ;;  %v339_v15 = vld [vmem:[%s451_s1 + $0x38] sm:$0xff]   ;;  %v340_v16 = vld [vmem:[%s451_s1 + $0x40] sm:$0xff]   ;;  %v341_v17 = vld [vmem:[%s451_s1 + $0x48] sm:$0xff]  }
   0x6   :  { %138 = vmatpush1.bf16.msra.mxu0 %v333_v3  ;;  %v342_v18 = vld [vmem:[%s451_s1 + $0x50] sm:$0xff]   ;;  %v343_v19 = vld [vmem:[%s451_s1 + $0x58] sm:$0xff]   ;;  %v350_v21 = vld [vmem:[%s453_s3 + $0x20] sm:$0xff]  }
   0x7   :  { %139 = vmatprep.subr.bf16.mxu0 %v352_v0  ;;  %v351_v22 = vld [vmem:[%s453_s3 + $0x28] sm:$0xff]   ;;  %v282_v23 = vld [vmem:[%s454_s2] ss:$0 sm:$0xff] }
   0x8   :  { %316 = vmatpush3.bf16.msra.mxu1 %v347_v10  ;;  %v298_v31 = vld [vmem:[%s455_s4] ss:$0 sm:$0xff] }
   0x9   :  { %317 = vmatprep.subr.bf16.mxu1 %v353_v2 }
   0xa   :  { %140 = vmatpush1.bf16.msra.mxu0 %v334_v4 }
   0xb   :  { %141 = vmatprep.subr.bf16.mxu0 %v352_v0 }
   0xc   :  { %318 = vmatpush3.bf16.msra.mxu1 %v348_v12 }
   0xd   :  { %319 = vmatprep.subr.bf16.mxu1 %v353_v2 }
   0xe   :  { %142 = vmatpush1.bf16.msra.mxu0 %v335_v5 }
   0xf   :  { %143 = vmatprep.subr.bf16.mxu0 %v352_v0 }
  0x10   :  { %320 = vmatpush3.bf16.msra.mxu1 %v349_v14 }
  0x11   :  { %321 = vmatprep.subr.bf16.mxu1 %v353_v2 }
  0x12   :  { %144 = vmatpush1.bf16.msra.mxu0 %v336_v9 }
  0x13   :  { %145 = vmatprep.subr.bf16.mxu0 %v352_v0 }
  0x14   :  { %322 = vmatpush3.bf16.msra.mxu1 %v350_v21 }
  0x15   :  { %323 = vmatprep.subr.bf16.mxu1 %v353_v2 }
  0x16   :  { %146 = vmatpush1.bf16.msra.mxu0 %v337_v11 }
  0x17   :  { %147 = vmatprep.subr.bf16.mxu0 %v352_v0 }
  0x18   :  { %324 = vmatpush3.bf16.msra.mxu1 %v351_v22 }
  0x1a   :  { %148 = vmatpush1.bf16.msra.mxu0 %v338_v13 }
  0x1b   :  { %149 = vmatprep.subr.bf16.mxu0 %v352_v0 }
  0x1e   :  { %150 = vmatpush1.bf16.msra.mxu0 %v339_v15 }
  0x1f   :  { %151 = vmatprep.subr.bf16.mxu0 %v352_v0 }
  0x22   :  { %152 = vmatpush1.bf16.msra.mxu0 %v340_v16 }
  0x23   :  { %153 = vmatprep.subr.bf16.mxu0 %v352_v0 }
  0x26   :  { %154 = vmatpush1.bf16.msra.mxu0 %v341_v17 }
  0x27   :  { %155 = vmatprep.subr.bf16.mxu0 %v352_v0 }
  0x2a   :  { %156 = vmatpush1.bf16.msra.mxu0 %v342_v18 }
  0x2b   :  { %157 = vmatprep.subr.bf16.mxu0 %v352_v0 }
  0x2e   :  { %158 = vmatpush1.bf16.msra.mxu0 %v343_v19 }
  0x31   :  { %168 = vmatmul.mubr.bf16.vlgmr.msra.gmra.mrb[0].mxu0 %v283_v20 }
 0x104   :  { %v169_v24 = vpop.f32.mrb[0].mxu0 }
 0x105   :  { %v170_v25 = vadd.f32 %v282_v23, %v169_v24  ;;  %v171_v26 = vpop.f32.mrb[1].mxu0 }
 0x106   :  { %v172_v27 = vpop.f32.mrb[2].mxu0 }
 0x107   :  { %v175_v28 = vmax.f32 %v170_v25, 0.0  ;;  %v173_v29 = vpop.f32.mrb[3].mxu0 }
 0x109   :  { %v176_v30 = vpack.c.bf16 %v175_v28, %v175_v28 }
 0x10b   :  { %326 = vmatmul.mubr.msk.bf16.vlgmr.msra.gmra.mrb[0].mxu1 %vm232_vm2, %v176_v30 }
 0x1de   :  { %v270_v32 = vpop.f32.mrb[0].mxu1 }
 0x1df   :  { %v271_v33 = vadd.f32 %v298_v31, %v270_v32  ;;  %v327_v34 = vpop.f32.mrb[1].mxu1 }
 0x1e0   :  { %v273_v35 = vpop.f32.mrb[2].mxu1 }
 0x1e1   :  { %277 = vst.msk [vmem:[%s456_s5] sm:$0xff] %vm276_vm3, %v271_v33  ;;  %v328_v36 = vpop.f32.mrb[3].mxu1 }

</bundles_post_ra>
